<compile_context>
chip_gen: v7x
topology: tpu7x:2x2x1
jax: 0.10.0
libtpu: 0.0.40
codegen_flags: <defaults>
</compile_context>

<pallas_src>
import functools

import jax
import jax.numpy as jnp
from jax import lax
from jax.experimental import pallas as pl
from jax.experimental.pallas import tpu as pltpu


def _resblock_kernel(x_ref, m_ref, w_ref, p_ref, o_ref, *, alpha, kernel, pad, count):
    # x_ref: (Cp, NLp) f32      padded activation slab (NLp = pad128(N*L))
    # m_ref: (K, NLp)  f32      per-tap boundary/validity masks (zero "same" padding)
    # w_ref: (2K, Cp, Cp) f32   w_ref[m*K + k][c_out, c_in] = w_m[c_out, c_in, k]
    # p_ref: (4, Cp, 1) f32     g1, be1, g2, be2   (conv biases dropped: BN cancels them)
    # o_ref: (Cp, NLp) f32
    Cp, NLp = x_ref.shape
    K = kernel
    eps = 1e-5
    inv_cnt = 1.0 / count                     # divide stats by the TRUE N*L count

    x = x_ref[...]
    # Identity-tap mask == validity mask (1 iff lane index < N*L).
    valid = m_ref[pl.ds(pad, 1), :]           # (1, NLp)

    def leaky(v):
        return jnp.where(v >= 0.0, v, 0.1 * v)

    def conv(h, m):
        # K taps: lane rotate (XLU slot) + per-tap boundary mask, then a (Cp,Cp)
        # channel-mix matmul per tap accumulated in f32.  No im2col slab.
        acc = jnp.zeros((Cp, NLp), jnp.float32)
        for k in range(K):
            sh = (pad - k) % NLp              # result[j] = h[j + k - pad]
            hk = h if sh == 0 else pltpu.roll(h, sh, axis=1)
            shifted = hk * m_ref[pl.ds(k, 1), :]
            acc = acc + jnp.dot(w_ref[m * K + k], shifted,
                                preferred_element_type=jnp.float32)
        return acc

    def batchnorm(h, g, be):
        # Training-mode BN over the N*L valid positions; two-pass (centered) variance.
        # Padded lanes of h are exactly zero (conv masks force it), so the plain sum
        # is the valid-lane sum; center + mask before squaring.
        mean = jnp.sum(h, axis=1, keepdims=True) * inv_cnt
        d = (h - mean) * valid
        var = jnp.sum(d * d, axis=1, keepdims=True) * inv_cnt
        inv = lax.rsqrt(var + eps)
        return (h - mean) * (inv * g) + be

    h = leaky(x)
    h = batchnorm(conv(h, 0), p_ref[0], p_ref[1])
    h = leaky(h)
    h = batchnorm(conv(h, 1), p_ref[2], p_ref[3])

    # Single lane-dense full-ref store.
    o_ref[...] = (x + alpha * h).astype(o_ref.dtype)


def resblock_pallas(x, params, *, alpha=0.5, kernel=5):
    """x: (N, C, L) float32; params: (w1, b1, g1, be1, w2, b2, g2, be2).

    b1/b2 are accepted (to mirror nn.Conv1d) but not sent to the kernel: a per-channel
    bias immediately followed by training-mode BatchNorm is a mathematical no-op.
    """
    w1, _b1, g1, be1, w2, _b2, g2, be2 = params
    N, C, L = x.shape
    K = kernel
    pad = K // 2
    NL = N * L

    # Lane/sublane alignment: C -> multiple of 8 (sublanes), N*L -> multiple of 128.
    Cp = max(8, ((C + 7) // 8) * 8)
    NLp = ((NL + 127) // 128) * 128

    # Layout plumbing outside the kernel: (N, C, L) -> (C, N*L), zero-pad to (Cp, NLp).
    x_slab = jnp.transpose(x, (1, 0, 2)).reshape(C, NL).astype(jnp.float32)
    x_slab = jnp.pad(x_slab, ((0, Cp - C), (0, NLp - NL)))

    # Per-tap boundary/validity masks (K, NLp): mask[k, j] = 1 iff j < N*L AND the
    # tap's read position (j % L) + k - pad stays inside the same sample
    # (i.e. zero "same" padding, no cross-sample / wrap-around reads).
    j = jnp.arange(NLp, dtype=jnp.int32)
    p_in = j % L
    in_valid = j < NL
    masks = jnp.stack(
        [((p_in + (k - pad) >= 0) & (p_in + (k - pad) < L) & in_valid).astype(jnp.float32)
         for k in range(K)],
        axis=0)                                                   # (K, NLp)

    # Pack conv weights per tap: W[m*K + k][c_out, c_in] = w_m[c_out, c_in, k],
    # zero-padded to (Cp, Cp).
    def pack_w(w):
        wk = jnp.transpose(w.astype(jnp.float32), (2, 0, 1))      # (K, C, C)
        return jnp.pad(wk, ((0, 0), (0, Cp - C), (0, Cp - C)))    # (K, Cp, Cp)
    W = jnp.concatenate([pack_w(w1), pack_w(w2)], axis=0)         # (2K, Cp, Cp)

    # Per-channel BN params (gamma padded with 1, beta with 0; padded rows trimmed).
    def pad_c(v, fill):
        return jnp.pad(v.astype(jnp.float32), (0, Cp - C), constant_values=fill)
    P = jnp.stack([pad_c(g1, 1.0), pad_c(be1, 0.0),
                   pad_c(g2, 1.0), pad_c(be2, 0.0)], axis=0).reshape(4, Cp, 1)

    vmem = pl.BlockSpec(memory_space=pltpu.MemorySpace.VMEM)
    out_slab = pl.pallas_call(
        functools.partial(_resblock_kernel, alpha=alpha, kernel=K, pad=pad, count=NL),
        out_shape=jax.ShapeDtypeStruct((Cp, NLp), jnp.float32),
        in_specs=[vmem, vmem, vmem, vmem],
        out_specs=vmem,
        compiler_params=pltpu.CompilerParams(vmem_limit_bytes=56 * 1024 * 1024),
    )(x_slab, masks, W, P)

    # Trim padding: (Cp, NLp) -> (C, N*L) -> (N, C, L)
    out = out_slab[:C, :NL].reshape(C, N, L)
    return jnp.transpose(out, (1, 0, 2)).astype(x.dtype)


def resblock_ref(x, params, *, alpha=0.5, kernel=5):
    """Pure-JAX reference mirroring PyTorch semantics (training-mode BatchNorm,
    conv bias included)."""
    pad = kernel // 2
    w1, b1, g1, be1, w2, b2, g2, be2 = params

    def leaky(v):
        return jnp.where(v >= 0, v, 0.1 * v)

    def conv(h, w, b):
        y = lax.conv_general_dilated(h, w, window_strides=(1,), padding=[(pad, pad)],
                                     dimension_numbers=('NCH', 'OIH', 'NCH'))
        return y + b[None, :, None]

    def bn(y, g, be):
        mean = jnp.mean(y, axis=(0, 2), keepdims=True)
        var = jnp.mean((y - mean) ** 2, axis=(0, 2), keepdims=True)
        return (y - mean) / jnp.sqrt(var + 1e-5) * g[None, :, None] + be[None, :, None]

    h = leaky(x)
    h = bn(conv(h, w1, b1), g1, be1)
    h = leaky(h)
    h = bn(conv(h, w2, b2), g2, be2)
    return x + alpha * h


if __name__ == "__main__":
    N, C, L = 2, 4, 16
    KERNEL, ALPHA = 5, 0.5

    key = jax.random.PRNGKey(0)
    keys = jax.random.split(key, 9)
    x = jax.random.normal(keys[0], (N, C, L), jnp.float32)

    # Deterministic parameter init (shapes follow nn.Conv1d / nn.BatchNorm1d).
    w1 = 0.2 * jax.random.normal(keys[1], (C, C, KERNEL), jnp.float32)
    b1 = 0.1 * jax.random.normal(keys[2], (C,), jnp.float32)
    w2 = 0.2 * jax.random.normal(keys[3], (C, C, KERNEL), jnp.float32)
    b2 = 0.1 * jax.random.normal(keys[4], (C,), jnp.float32)
    g1 = 1.0 + 0.1 * jax.random.normal(keys[5], (C,), jnp.float32)
    be1 = 0.1 * jax.random.normal(keys[6], (C,), jnp.float32)
    g2 = 1.0 + 0.1 * jax.random.normal(keys[7], (C,), jnp.float32)
    be2 = 0.1 * jax.random.normal(keys[8], (C,), jnp.float32)
    params = (w1, b1, g1, be1, w2, b2, g2, be2)

    out = resblock_pallas(x, params, alpha=ALPHA, kernel=KERNEL)
    out = jax.block_until_ready(out)

    ref = resblock_ref(x, params, alpha=ALPHA, kernel=KERNEL)
    assert out.shape == (N, C, L) and out.dtype == jnp.float32
    assert jnp.allclose(out, ref, atol=1e-3, rtol=1e-3), float(jnp.max(jnp.abs(out - ref)))

    print("KERNEL_OK")
</pallas_src>

<mosaic_0001>
module attributes {stable_mosaic.version = 11 : i64} {
  func.func @_resblock_kernel(%arg0: memref<8x128xf32, #tpu.memory_space<vmem>>, %arg1: memref<5x128xf32, #tpu.memory_space<vmem>>, %arg2: memref<10x8x8xf32, #tpu.memory_space<vmem>>, %arg3: memref<4x8x1xf32, #tpu.memory_space<vmem>>, %arg4: memref<8x128xf32, #tpu.memory_space<vmem>>) attributes {dimension_semantics = [], scalar_prefetch = 0 : i64, scratch_operands = 0 : i64, tpu.core_type = #tpu.core_type<tc>} {
    %c0 = arith.constant 0 : index
    %c0_0 = arith.constant 0 : index
    %0 = vector.load %arg0[%c0, %c0_0] : memref<8x128xf32, #tpu.memory_space<vmem>>, vector<8x128xf32>
    %c2 = arith.constant 2 : index
    %c0_1 = arith.constant 0 : index
    %1 = vector.load %arg1[%c2, %c0_1] : memref<5x128xf32, #tpu.memory_space<vmem>>, vector<1x128xf32>
    %cst = arith.constant 0.000000e+00 : f32
    %2 = vector.broadcast %cst : f32 to vector<8x128xf32>
    %3 = arith.cmpf oge, %0, %2 : vector<8x128xf32>
    %cst_2 = arith.constant 1.000000e-01 : f32
    %4 = vector.broadcast %cst_2 : f32 to vector<8x128xf32>
    %5 = arith.mulf %4, %0 : vector<8x128xf32>
    %6 = arith.select %3, %0, %5 : vector<8x128xi1>, vector<8x128xf32>
    %cst_3 = arith.constant 0.000000e+00 : f32
    %7 = vector.broadcast %cst_3 : f32 to vector<8x128xf32>
    %c2_i32 = arith.constant 2 : i32
    %8 = tpu.dynamic_rotate %6 by %c2_i32 dim 1 : vector<8x128xf32>, i32 -> vector<8x128xf32>
    %c0_4 = arith.constant 0 : index
    %c0_5 = arith.constant 0 : index
    %9 = vector.load %arg1[%c0_4, %c0_5] : memref<5x128xf32, #tpu.memory_space<vmem>>, vector<1x128xf32>
    %10 = vector.broadcast %9 : vector<1x128xf32> to vector<8x128xf32>
    %11 = arith.mulf %8, %10 : vector<8x128xf32>
    %c0_6 = arith.constant 0 : index
    %c0_7 = arith.constant 0 : index
    %c0_8 = arith.constant 0 : index
    %12 = vector.load %arg2[%c0_6, %c0_7, %c0_8] : memref<10x8x8xf32, #tpu.memory_space<vmem>>, vector<1x8x8xf32>
    %13 = vector.shape_cast %12 : vector<1x8x8xf32> to vector<8x8xf32>
    %cst_9 = arith.constant dense<0.000000e+00> : vector<8x128xf32>
    %14 = tpu.matmul %13, %11, %cst_9 {dimension_numbers = #tpu.dot_dimension_numbers<[1], [0], [0], [1], [0, 0, 1, 1], [], []>} : vector<8x8xf32>, vector<8x128xf32>, vector<8x128xf32> -> vector<8x128xf32>
    %15 = arith.addf %7, %14 : vector<8x128xf32>
    %c1_i32 = arith.constant 1 : i32
    %16 = tpu.dynamic_rotate %6 by %c1_i32 dim 1 : vector<8x128xf32>, i32 -> vector<8x128xf32>
    %c1 = arith.constant 1 : index
    %c0_10 = arith.constant 0 : index
    %17 = vector.load %arg1[%c1, %c0_10] : memref<5x128xf32, #tpu.memory_space<vmem>>, vector<1x128xf32>
    %18 = vector.broadcast %17 : vector<1x128xf32> to vector<8x128xf32>
    %19 = arith.mulf %16, %18 : vector<8x128xf32>
    %c1_11 = arith.constant 1 : index
    %c0_12 = arith.constant 0 : index
    %c0_13 = arith.constant 0 : index
    %20 = vector.load %arg2[%c1_11, %c0_12, %c0_13] : memref<10x8x8xf32, #tpu.memory_space<vmem>>, vector<1x8x8xf32>
    %21 = vector.shape_cast %20 : vector<1x8x8xf32> to vector<8x8xf32>
    %cst_14 = arith.constant dense<0.000000e+00> : vector<8x128xf32>
    %22 = tpu.matmul %21, %19, %cst_14 {dimension_numbers = #tpu.dot_dimension_numbers<[1], [0], [0], [1], [0, 0, 1, 1], [], []>} : vector<8x8xf32>, vector<8x128xf32>, vector<8x128xf32> -> vector<8x128xf32>
    %23 = arith.addf %15, %22 : vector<8x128xf32>
    %c2_15 = arith.constant 2 : index
    %c0_16 = arith.constant 0 : index
    %24 = vector.load %arg1[%c2_15, %c0_16] : memref<5x128xf32, #tpu.memory_space<vmem>>, vector<1x128xf32>
    %25 = vector.broadcast %24 : vector<1x128xf32> to vector<8x128xf32>
    %26 = arith.mulf %6, %25 : vector<8x128xf32>
    %c2_17 = arith.constant 2 : index
    %c0_18 = arith.constant 0 : index
    %c0_19 = arith.constant 0 : index
    %27 = vector.load %arg2[%c2_17, %c0_18, %c0_19] : memref<10x8x8xf32, #tpu.memory_space<vmem>>, vector<1x8x8xf32>
    %28 = vector.shape_cast %27 : vector<1x8x8xf32> to vector<8x8xf32>
    %cst_20 = arith.constant dense<0.000000e+00> : vector<8x128xf32>
    %29 = tpu.matmul %28, %26, %cst_20 {dimension_numbers = #tpu.dot_dimension_numbers<[1], [0], [0], [1], [0, 0, 1, 1], [], []>} : vector<8x8xf32>, vector<8x128xf32>, vector<8x128xf32> -> vector<8x128xf32>
    %30 = arith.addf %23, %29 : vector<8x128xf32>
    %c127_i32 = arith.constant 127 : i32
    %31 = tpu.dynamic_rotate %6 by %c127_i32 dim 1 : vector<8x128xf32>, i32 -> vector<8x128xf32>
    %c3 = arith.constant 3 : index
    %c0_21 = arith.constant 0 : index
    %32 = vector.load %arg1[%c3, %c0_21] : memref<5x128xf32, #tpu.memory_space<vmem>>, vector<1x128xf32>
    %33 = vector.broadcast %32 : vector<1x128xf32> to vector<8x128xf32>
    %34 = arith.mulf %31, %33 : vector<8x128xf32>
    %c3_22 = arith.constant 3 : index
    %c0_23 = arith.constant 0 : index
    %c0_24 = arith.constant 0 : index
    %35 = vector.load %arg2[%c3_22, %c0_23, %c0_24] : memref<10x8x8xf32, #tpu.memory_space<vmem>>, vector<1x8x8xf32>
    %36 = vector.shape_cast %35 : vector<1x8x8xf32> to vector<8x8xf32>
    %cst_25 = arith.constant dense<0.000000e+00> : vector<8x128xf32>
    %37 = tpu.matmul %36, %34, %cst_25 {dimension_numbers = #tpu.dot_dimension_numbers<[1], [0], [0], [1], [0, 0, 1, 1], [], []>} : vector<8x8xf32>, vector<8x128xf32>, vector<8x128xf32> -> vector<8x128xf32>
    %38 = arith.addf %30, %37 : vector<8x128xf32>
    %c126_i32 = arith.constant 126 : i32
    %39 = tpu.dynamic_rotate %6 by %c126_i32 dim 1 : vector<8x128xf32>, i32 -> vector<8x128xf32>
    %c4 = arith.constant 4 : index
    %c0_26 = arith.constant 0 : index
    %40 = vector.load %arg1[%c4, %c0_26] : memref<5x128xf32, #tpu.memory_space<vmem>>, vector<1x128xf32>
    %41 = vector.broadcast %40 : vector<1x128xf32> to vector<8x128xf32>
    %42 = arith.mulf %39, %41 : vector<8x128xf32>
    %c4_27 = arith.constant 4 : index
    %c0_28 = arith.constant 0 : index
    %c0_29 = arith.constant 0 : index
    %43 = vector.load %arg2[%c4_27, %c0_28, %c0_29] : memref<10x8x8xf32, #tpu.memory_space<vmem>>, vector<1x8x8xf32>
    %44 = vector.shape_cast %43 : vector<1x8x8xf32> to vector<8x8xf32>
    %cst_30 = arith.constant dense<0.000000e+00> : vector<8x128xf32>
    %45 = tpu.matmul %44, %42, %cst_30 {dimension_numbers = #tpu.dot_dimension_numbers<[1], [0], [0], [1], [0, 0, 1, 1], [], []>} : vector<8x8xf32>, vector<8x128xf32>, vector<8x128xf32> -> vector<8x128xf32>
    %46 = arith.addf %38, %45 : vector<8x128xf32>
    %c0_31 = arith.constant 0 : index
    %c0_32 = arith.constant 0 : index
    %c0_33 = arith.constant 0 : index
    %47 = vector.load %arg3[%c0_31, %c0_32, %c0_33] : memref<4x8x1xf32, #tpu.memory_space<vmem>>, vector<1x8x1xf32>
    %48 = vector.shape_cast %47 : vector<1x8x1xf32> to vector<8x1xf32>
    %c1_34 = arith.constant 1 : index
    %c0_35 = arith.constant 0 : index
    %c0_36 = arith.constant 0 : index
    %49 = vector.load %arg3[%c1_34, %c0_35, %c0_36] : memref<4x8x1xf32, #tpu.memory_space<vmem>>, vector<1x8x1xf32>
    %50 = vector.shape_cast %49 : vector<1x8x1xf32> to vector<8x1xf32>
    %cst_37 = arith.constant dense<0.000000e+00> : vector<8xf32>
    %51 = vector.multi_reduction <add>, %46, %cst_37 [1] : vector<8x128xf32> to vector<8xf32>
    %52 = vector.shape_cast %51 : vector<8xf32> to vector<8x1xf32>
    %cst_38 = arith.constant 3.125000e-02 : f32
    %53 = vector.broadcast %cst_38 : f32 to vector<8x1xf32>
    %54 = arith.mulf %52, %53 : vector<8x1xf32>
    %55 = vector.broadcast %54 : vector<8x1xf32> to vector<8x128xf32>
    %56 = arith.subf %46, %55 : vector<8x128xf32>
    %57 = vector.broadcast %1 : vector<1x128xf32> to vector<8x128xf32>
    %58 = arith.mulf %56, %57 : vector<8x128xf32>
    %59 = arith.mulf %58, %58 : vector<8x128xf32>
    %cst_39 = arith.constant dense<0.000000e+00> : vector<8xf32>
    %60 = vector.multi_reduction <add>, %59, %cst_39 [1] : vector<8x128xf32> to vector<8xf32>
    %61 = vector.shape_cast %60 : vector<8xf32> to vector<8x1xf32>
    %cst_40 = arith.constant 3.125000e-02 : f32
    %62 = vector.broadcast %cst_40 : f32 to vector<8x1xf32>
    %63 = arith.mulf %61, %62 : vector<8x1xf32>
    %cst_41 = arith.constant 9.99999974E-6 : f32
    %64 = vector.broadcast %cst_41 : f32 to vector<8x1xf32>
    %65 = arith.addf %63, %64 : vector<8x1xf32>
    %66 = math.rsqrt %65 : vector<8x1xf32>
    %67 = vector.broadcast %54 : vector<8x1xf32> to vector<8x128xf32>
    %68 = arith.subf %46, %67 : vector<8x128xf32>
    %69 = arith.mulf %66, %48 : vector<8x1xf32>
    %70 = vector.broadcast %69 : vector<8x1xf32> to vector<8x128xf32>
    %71 = arith.mulf %68, %70 : vector<8x128xf32>
    %72 = vector.broadcast %50 : vector<8x1xf32> to vector<8x128xf32>
    %73 = arith.addf %71, %72 : vector<8x128xf32>
    %cst_42 = arith.constant 0.000000e+00 : f32
    %74 = vector.broadcast %cst_42 : f32 to vector<8x128xf32>
    %75 = arith.cmpf oge, %73, %74 : vector<8x128xf32>
    %cst_43 = arith.constant 1.000000e-01 : f32
    %76 = vector.broadcast %cst_43 : f32 to vector<8x128xf32>
    %77 = arith.mulf %76, %73 : vector<8x128xf32>
    %78 = arith.select %75, %73, %77 : vector<8x128xi1>, vector<8x128xf32>
    %cst_44 = arith.constant 0.000000e+00 : f32
    %79 = vector.broadcast %cst_44 : f32 to vector<8x128xf32>
    %c2_i32_45 = arith.constant 2 : i32
    %80 = tpu.dynamic_rotate %78 by %c2_i32_45 dim 1 : vector<8x128xf32>, i32 -> vector<8x128xf32>
    %c0_46 = arith.constant 0 : index
    %c0_47 = arith.constant 0 : index
    %81 = vector.load %arg1[%c0_46, %c0_47] : memref<5x128xf32, #tpu.memory_space<vmem>>, vector<1x128xf32>
    %82 = vector.broadcast %81 : vector<1x128xf32> to vector<8x128xf32>
    %83 = arith.mulf %80, %82 : vector<8x128xf32>
    %c5 = arith.constant 5 : index
    %c0_48 = arith.constant 0 : index
    %c0_49 = arith.constant 0 : index
    %84 = vector.load %arg2[%c5, %c0_48, %c0_49] : memref<10x8x8xf32, #tpu.memory_space<vmem>>, vector<1x8x8xf32>
    %85 = vector.shape_cast %84 : vector<1x8x8xf32> to vector<8x8xf32>
    %cst_50 = arith.constant dense<0.000000e+00> : vector<8x128xf32>
    %86 = tpu.matmul %85, %83, %cst_50 {dimension_numbers = #tpu.dot_dimension_numbers<[1], [0], [0], [1], [0, 0, 1, 1], [], []>} : vector<8x8xf32>, vector<8x128xf32>, vector<8x128xf32> -> vector<8x128xf32>
    %87 = arith.addf %79, %86 : vector<8x128xf32>
    %c1_i32_51 = arith.constant 1 : i32
    %88 = tpu.dynamic_rotate %78 by %c1_i32_51 dim 1 : vector<8x128xf32>, i32 -> vector<8x128xf32>
    %c1_52 = arith.constant 1 : index
    %c0_53 = arith.constant 0 : index
    %89 = vector.load %arg1[%c1_52, %c0_53] : memref<5x128xf32, #tpu.memory_space<vmem>>, vector<1x128xf32>
    %90 = vector.broadcast %89 : vector<1x128xf32> to vector<8x128xf32>
    %91 = arith.mulf %88, %90 : vector<8x128xf32>
    %c6 = arith.constant 6 : index
    %c0_54 = arith.constant 0 : index
    %c0_55 = arith.constant 0 : index
    %92 = vector.load %arg2[%c6, %c0_54, %c0_55] : memref<10x8x8xf32, #tpu.memory_space<vmem>>, vector<1x8x8xf32>
    %93 = vector.shape_cast %92 : vector<1x8x8xf32> to vector<8x8xf32>
    %cst_56 = arith.constant dense<0.000000e+00> : vector<8x128xf32>
    %94 = tpu.matmul %93, %91, %cst_56 {dimension_numbers = #tpu.dot_dimension_numbers<[1], [0], [0], [1], [0, 0, 1, 1], [], []>} : vector<8x8xf32>, vector<8x128xf32>, vector<8x128xf32> -> vector<8x128xf32>
    %95 = arith.addf %87, %94 : vector<8x128xf32>
    %c2_57 = arith.constant 2 : index
    %c0_58 = arith.constant 0 : index
    %96 = vector.load %arg1[%c2_57, %c0_58] : memref<5x128xf32, #tpu.memory_space<vmem>>, vector<1x128xf32>
    %97 = vector.broadcast %96 : vector<1x128xf32> to vector<8x128xf32>
    %98 = arith.mulf %78, %97 : vector<8x128xf32>
    %c7 = arith.constant 7 : index
    %c0_59 = arith.constant 0 : index
    %c0_60 = arith.constant 0 : index
    %99 = vector.load %arg2[%c7, %c0_59, %c0_60] : memref<10x8x8xf32, #tpu.memory_space<vmem>>, vector<1x8x8xf32>
    %100 = vector.shape_cast %99 : vector<1x8x8xf32> to vector<8x8xf32>
    %cst_61 = arith.constant dense<0.000000e+00> : vector<8x128xf32>
    %101 = tpu.matmul %100, %98, %cst_61 {dimension_numbers = #tpu.dot_dimension_numbers<[1], [0], [0], [1], [0, 0, 1, 1], [], []>} : vector<8x8xf32>, vector<8x128xf32>, vector<8x128xf32> -> vector<8x128xf32>
    %102 = arith.addf %95, %101 : vector<8x128xf32>
    %c127_i32_62 = arith.constant 127 : i32
    %103 = tpu.dynamic_rotate %78 by %c127_i32_62 dim 1 : vector<8x128xf32>, i32 -> vector<8x128xf32>
    %c3_63 = arith.constant 3 : index
    %c0_64 = arith.constant 0 : index
    %104 = vector.load %arg1[%c3_63, %c0_64] : memref<5x128xf32, #tpu.memory_space<vmem>>, vector<1x128xf32>
    %105 = vector.broadcast %104 : vector<1x128xf32> to vector<8x128xf32>
    %106 = arith.mulf %103, %105 : vector<8x128xf32>
    %c8 = arith.constant 8 : index
    %c0_65 = arith.constant 0 : index
    %c0_66 = arith.constant 0 : index
    %107 = vector.load %arg2[%c8, %c0_65, %c0_66] : memref<10x8x8xf32, #tpu.memory_space<vmem>>, vector<1x8x8xf32>
    %108 = vector.shape_cast %107 : vector<1x8x8xf32> to vector<8x8xf32>
    %cst_67 = arith.constant dense<0.000000e+00> : vector<8x128xf32>
    %109 = tpu.matmul %108, %106, %cst_67 {dimension_numbers = #tpu.dot_dimension_numbers<[1], [0], [0], [1], [0, 0, 1, 1], [], []>} : vector<8x8xf32>, vector<8x128xf32>, vector<8x128xf32> -> vector<8x128xf32>
    %110 = arith.addf %102, %109 : vector<8x128xf32>
    %c126_i32_68 = arith.constant 126 : i32
    %111 = tpu.dynamic_rotate %78 by %c126_i32_68 dim 1 : vector<8x128xf32>, i32 -> vector<8x128xf32>
    %c4_69 = arith.constant 4 : index
    %c0_70 = arith.constant 0 : index
    %112 = vector.load %arg1[%c4_69, %c0_70] : memref<5x128xf32, #tpu.memory_space<vmem>>, vector<1x128xf32>
    %113 = vector.broadcast %112 : vector<1x128xf32> to vector<8x128xf32>
    %114 = arith.mulf %111, %113 : vector<8x128xf32>
    %c9 = arith.constant 9 : index
    %c0_71 = arith.constant 0 : index
    %c0_72 = arith.constant 0 : index
    %115 = vector.load %arg2[%c9, %c0_71, %c0_72] : memref<10x8x8xf32, #tpu.memory_space<vmem>>, vector<1x8x8xf32>
    %116 = vector.shape_cast %115 : vector<1x8x8xf32> to vector<8x8xf32>
    %cst_73 = arith.constant dense<0.000000e+00> : vector<8x128xf32>
    %117 = tpu.matmul %116, %114, %cst_73 {dimension_numbers = #tpu.dot_dimension_numbers<[1], [0], [0], [1], [0, 0, 1, 1], [], []>} : vector<8x8xf32>, vector<8x128xf32>, vector<8x128xf32> -> vector<8x128xf32>
    %118 = arith.addf %110, %117 : vector<8x128xf32>
    %c2_74 = arith.constant 2 : index
    %c0_75 = arith.constant 0 : index
    %c0_76 = arith.constant 0 : index
    %119 = vector.load %arg3[%c2_74, %c0_75, %c0_76] : memref<4x8x1xf32, #tpu.memory_space<vmem>>, vector<1x8x1xf32>
    %120 = vector.shape_cast %119 : vector<1x8x1xf32> to vector<8x1xf32>
    %c3_77 = arith.constant 3 : index
    %c0_78 = arith.constant 0 : index
    %c0_79 = arith.constant 0 : index
    %121 = vector.load %arg3[%c3_77, %c0_78, %c0_79] : memref<4x8x1xf32, #tpu.memory_space<vmem>>, vector<1x8x1xf32>
    %122 = vector.shape_cast %121 : vector<1x8x1xf32> to vector<8x1xf32>
    %cst_80 = arith.constant dense<0.000000e+00> : vector<8xf32>
    %123 = vector.multi_reduction <add>, %118, %cst_80 [1] : vector<8x128xf32> to vector<8xf32>
    %124 = vector.shape_cast %123 : vector<8xf32> to vector<8x1xf32>
    %cst_81 = arith.constant 3.125000e-02 : f32
    %125 = vector.broadcast %cst_81 : f32 to vector<8x1xf32>
    %126 = arith.mulf %124, %125 : vector<8x1xf32>
    %127 = vector.broadcast %126 : vector<8x1xf32> to vector<8x128xf32>
    %128 = arith.subf %118, %127 : vector<8x128xf32>
    %129 = vector.broadcast %1 : vector<1x128xf32> to vector<8x128xf32>
    %130 = arith.mulf %128, %129 : vector<8x128xf32>
    %131 = arith.mulf %130, %130 : vector<8x128xf32>
    %cst_82 = arith.constant dense<0.000000e+00> : vector<8xf32>
    %132 = vector.multi_reduction <add>, %131, %cst_82 [1] : vector<8x128xf32> to vector<8xf32>
    %133 = vector.shape_cast %132 : vector<8xf32> to vector<8x1xf32>
    %cst_83 = arith.constant 3.125000e-02 : f32
    %134 = vector.broadcast %cst_83 : f32 to vector<8x1xf32>
    %135 = arith.mulf %133, %134 : vector<8x1xf32>
    %cst_84 = arith.constant 9.99999974E-6 : f32
    %136 = vector.broadcast %cst_84 : f32 to vector<8x1xf32>
    %137 = arith.addf %135, %136 : vector<8x1xf32>
    %138 = math.rsqrt %137 : vector<8x1xf32>
    %139 = vector.broadcast %126 : vector<8x1xf32> to vector<8x128xf32>
    %140 = arith.subf %118, %139 : vector<8x128xf32>
    %141 = arith.mulf %138, %120 : vector<8x1xf32>
    %142 = vector.broadcast %141 : vector<8x1xf32> to vector<8x128xf32>
    %143 = arith.mulf %140, %142 : vector<8x128xf32>
    %144 = vector.broadcast %122 : vector<8x1xf32> to vector<8x128xf32>
    %145 = arith.addf %143, %144 : vector<8x128xf32>
    %cst_85 = arith.constant 5.000000e-01 : f32
    %146 = vector.broadcast %cst_85 : f32 to vector<8x128xf32>
    %147 = arith.mulf %146, %145 : vector<8x128xf32>
    %148 = arith.addf %0, %147 : vector<8x128xf32>
    %c0_86 = arith.constant 0 : index
    %c0_87 = arith.constant 0 : index
    %149 = vector.load %arg4[%c0_86, %c0_87] : memref<8x128xf32, #tpu.memory_space<vmem>>, vector<8x128xf32>
    tpu.vector_store %arg4[%c0_86, %c0_87], %148 {strides = array<i32>} : memref<8x128xf32, #tpu.memory_space<vmem>>, vector<8x128xf32>,
    return
  }
}

</mosaic_0001>

<bundles_post_ra>
// kernel: tpu_custom_call.1
= control target key start
LH: loop header
LB: loop body
LE: loop exit
PB: predicated region body
PF: predicated region fallthrough
CT: control target
= control target key end

     0   :  { %v1055_v2 = vmov 0.0   ;;  %vm1056_vm1 = vmmov 0   ;;  %s1058_s17 = smov 127   ;;  %s1236_s0 = inlined_call_operand.vmem [shape: f32[8,128], index: 0, kind: input, shape index: {}]   ;;  %s1237_s1 = inlined_call_operand.vmem [shape: f32[5,128], index: 1, kind: input, shape index: {}]   ;;  %s1238_s2 = inlined_call_operand.vmem [shape: f32[10,8,8], index: 2, kind: input, shape index: {}]   ;;  %s1239_s3 = inlined_call_operand.vmem [shape: f32[4,8,1], index: 3, kind: input, shape index: {}]   ;;  %s1240_s4 = inlined_call_operand.hbm [shape: f32[8,128], index: 4, kind: output, shape index: {}]  }
   0x1   :  { %v1091_v0 = vld [vmem:[%s1236_s0] sm:$0xff]  ;;  %951 = vmatprep.subr.mxu0 %v1055_v2  ;;  %976 = vmatprep.subr.mxu1 %v1055_v2  ;;  %s1057_s0 = smov 1  }
   0x2   :  { %vm20_vm0 = vcmp.ge.f32.partialorder %v1091_v0, 0.0  ;;  %v21_v1 = vmul.f32 0.1, %v1091_v0  ;;  %953 = vmatprep.mubr.msk.f32.mxu0 %vm1056_vm1, %v1055_v2  ;;  %978 = vmatprep.mubr.msk.f32.mxu1 %vm1056_vm1, %v1055_v2 }
   0x4   :  { %v22_v3 = vsel %vm20_vm0, %v1091_v0, %v21_v1 }
   0x5   :  { %32 = vrot.lane.b32.xlu0 %v22_v3, %s1057_s0  ;;  %270 = vrot.lane.b32.xlu1 %v22_v3, %s1058_s17 }
   0x6   :  { %9 = vsyncpa [#allocation3], 0  ;;  %s1059_s18 = smov 2   ;;  %s1060_s19 = smov 126   ;;  %v1109_v4 = vld [vmem:[%s1237_s1 + $0x1] ss:$0 sm:$0xff] }
   0x7   :  { %v906_v7 = vld [vmem:[%s1238_s2 + $0x8] sm:$0xff]  ;;  %vm42_vm2 = vcmask 64512   ;;  %v1118_v8 = vld [vmem:[%s1237_s1] ss:$0 sm:$0xff]  ;;  %v1128_v11 = vld [vmem:[%s1237_s1 + $0x2] ss:$0 sm:$0xff] }
   0x8   :  { %v31_v12 = vld [vmem:[%s1238_s2] sm:$0xff]  ;;  %v193_v13 = vmul.f32 %v1128_v11, %v22_v3  ;;  %v910_v17 = vld [vmem:[%s1238_s2 + $0x10] sm:$0xff]  ;;  %v913_v21 = vld [vmem:[%s1238_s2 + $0x18] sm:$0xff]  ;;  %v1061_v30 = vmov 0   ;;  %s1062_s29 = smov [#allocation2]  }
   0x9   :  { %23 = vrot.lane.b32.xlu0 %v22_v3, %s1059_s18  ;;  %354 = vrot.lane.b32.xlu1 %v22_v3, %s1060_s19  ;;  %v1141_v14 = vld [vmem:[%s1237_s1 + $0x3] ss:$0 sm:$0xff]  ;;  %v1154_v18 = vld [vmem:[%s1237_s1 + $0x4] ss:$0 sm:$0xff]  ;;  %s896_s30 = sshll.u32 %s1062_s29, 4  ;;  %s897_s30 = int_to_ptr.vmem [resolvable:$true] %s896_s30 }
   0xa   :  { %v916_v22 = vld [vmem:[%s1238_s2 + $0x20] sm:$0xff]  ;;  %1025 = vset.pattern.permute.xlu0 %v1061_v30  ;;  %1026 = vset.pattern.permute.xlu1 %v1061_v30  ;;  %v918_v31 = vld [vmem:[%s1239_s3 + $0x8] sm:$0xff]  ;;  %v920_v46 = vld [vmem:[%s1238_s2 + $0x30] sm:$0xff]  ;;  %s1031_s5 = scalar_lea.vmem %s897_s30, 128  ;;  %p1036_p1 = scmp.lt.s32.totalorder %s897_s30, %s897_s30 }
   0xb   :  { %v438_v35 = vld [vmem:[%s1239_s3] sm:$0xff]  ;;  %v919_v49 = vld [vmem:[%s1238_s2 + $0x28] sm:$0xff]  ;;  %v923_v52 = vld [vmem:[%s1238_s2 + $0x38] sm:$0xff]  ;;  %p1032_p0 = scmp.ne.s32.totalorder %s897_s30, %s1031_s5  ;;  %p1037_p2 = scmp.lt.s32.totalorder %s1031_s5, %s1031_s5 }
   0xc   :  { %v925_v55 = vld [vmem:[%s1238_s2 + $0x40] sm:$0xff]  ;;  %v927_v57 = vld [vmem:[%s1238_s2 + $0x48] sm:$0xff] }
   0xd   :  { %p1038_p3 = por %p1037_p2, %p1036_p1 }
   0xf   :  { %p1039_p4 = pnand %p1038_p3, %p1032_p0 }
  0x77   :  { %v33_v5 = vpop.permute.xlu0 %32  ;;  %v271_v15 = vpop.permute.xlu1 %270 }
  0x78   :  { %v39_v6 = vmul.f32 %v1109_v4, %v33_v5  ;;  %v277_v16 = vmul.f32 %v1141_v14, %v271_v15 }
  0x7a   :  { %952 = vmatpush3.msra.mxu0 %v39_v6  ;;  %v929_v6 = vld [vmem:[%s1239_s3 + $0x10] sm:$0xff] }
  0x7b   :  { %954 = vmatmul.mubr.msk.f32.vlgmr.msra.gmra.mrb[0].mxu0 %vm42_vm2, %v906_v7  ;;  %v24_v9 = vpop.permute.xlu0 %23  ;;  %956 = vmatprep.subr.mxu0 %v1055_v2  ;;  %v355_v19 = vpop.permute.xlu1 %354 }
  0x7c   :  { %v30_v10 = vmul.f32 %v1118_v8, %v24_v9  ;;  %958 = vmatprep.mubr.msk.f32.mxu0 %vm1056_vm1, %v1055_v2  ;;  %v361_v20 = vmul.f32 %v1154_v18, %v355_v19 }
  0x7e   :  { %957 = vmatpush3.msra.mxu0 %v30_v10 }
  0x7f   :  { %961 = vmatprep.subr.mxu0 %v1055_v2 }
  0x83   :  { %959 = vmatmul.mubr.msk.f32.vlgmr.msra.gmra.mrb[0].mxu0 %vm42_vm2, %v31_v12 }
  0x84   :  { %962 = vmatpush3.msra.mxu0 %v193_v13  ;;  %963 = vmatprep.mubr.msk.f32.mxu0 %vm1056_vm1, %v1055_v2 }
  0x85   :  { %966 = vmatprep.subr.mxu0 %v1055_v2 }
  0x8b   :  { %964 = vmatmul.mubr.msk.f32.vlgmr.msra.gmra.mrb[0].mxu0 %vm42_vm2, %v910_v17 }
  0x8c   :  { %967 = vmatpush3.msra.mxu0 %v277_v16  ;;  %968 = vmatprep.mubr.msk.f32.mxu0 %vm1056_vm1, %v1055_v2 }
  0x8d   :  { %971 = vmatprep.subr.mxu0 %v1055_v2 }
  0x93   :  { %969 = vmatmul.mubr.msk.f32.vlgmr.msra.gmra.mrb[0].mxu0 %vm42_vm2, %v913_v21 }
  0x94   :  { %972 = vmatpush3.msra.mxu0 %v361_v20  ;;  %973 = vmatprep.mubr.msk.f32.mxu0 %vm1056_vm1, %v1055_v2 }
  0x9b   :  { %974 = vmatmul.mubr.msk.f32.vlgmr.msra.gmra.mrb[0].mxu0 %vm42_vm2, %v916_v22 }
 0x16e   :  { %v433_v23 = vpop.f32.mrb[0].mxu0 }
 0x16f   :  { %441 = vadd.xlane.f32.xlu0 %v433_v23  ;;  %v975_v24 = vpop.f32.mrb[1].mxu0 }
 0x1fc   :  { %v442_v25 = vpop.xlane.xlu0 %441 }
 0x1fd   :  { %v443_v26 = vmul.f32 0.03125, %v442_v25 }
 0x1ff   :  { %v444_v27 = vsub.f32 %v433_v23, %v443_v26 }
 0x201   :  { %v445_v28 = vmul.f32 %v1128_v11, %v444_v27 }
 0x203   :  { %v446_v29 = vmul.f32 %v445_v28, %v445_v28 }
 0x205   :  { %447 = vadd.xlane.f32.xlu1 %v446_v29 }
 0x216   :  { %461 = vperm.xlu1 %1026, %v918_v31  }
 0x292   :  { %v448_v32 = vpop.xlane.xlu1 %447 }
 0x293   :  { %v449_v33 = vmul.f32 0.03125, %v448_v32 }
 0x295   :  { %v450_v34 = vadd.f32 1e-05, %v449_v33 }
 0x296   :  { %v462_v39 = vpop.permute.xlu1 %461 }
 0x297   :  { %1027 = vrsqrt.f32 %v450_v34 }
 0x2a1   :  { %v1028_v36 = vpop.eup %1027 }
 0x2a2   :  { %v452_v37 = vmul.f32 %v1028_v36, %v438_v35 }
 0x2a4   :  { %455 = vperm.xlu0 %1025, %v452_v37  }
 0x323   :  { %v456_v38 = vpop.permute.xlu0 %455 }
 0x324   :  { %v458_v40 = vmul.f32 %v456_v38, %v444_v27 }
 0x326   :  { %v464_v41 = vadd.f32 %v462_v39, %v458_v40 }
 0x328   :  { %vm465_vm3 = vcmp.ge.f32.partialorder %v464_v41, 0.0  ;;  %v466_v42 = vmul.f32 0.1, %v464_v41 }
 0x32a   :  { %v467_v43 = vsel %vm465_vm3, %v464_v41, %v466_v42 }
 0x32b   :  { %473 = vrot.lane.b32.xlu1 %v467_v43, %s1057_s0  ;;  %v624_v50 = vmul.f32 %v1128_v11, %v467_v43 }
 0x32f   :  { %468 = vrot.lane.b32.xlu1 %v467_v43, %s1059_s18 }
 0x333   :  { %701 = vrot.lane.b32.xlu1 %v467_v43, %s1058_s17 }
 0x337   :  { %780 = vrot.lane.b32.xlu1 %v467_v43, %s1060_s19 }
 0x39d   :  { %v474_v44 = vpop.permute.xlu1 %473 }
 0x39e   :  { %v475_v45 = vmul.f32 %v1109_v4, %v474_v44 }
 0x3a0   :  { %977 = vmatpush3.msra.mxu1 %v475_v45 }
 0x3a1   :  { %979 = vmatmul.mubr.msk.f32.vlgmr.msra.gmra.mrb[0].mxu1 %vm42_vm2, %v920_v46  ;;  %v469_v47 = vpop.permute.xlu1 %468  ;;  %981 = vmatprep.subr.mxu1 %v1055_v2 }
 0x3a2   :  { %v470_v48 = vmul.f32 %v1118_v8, %v469_v47  ;;  %983 = vmatprep.mubr.msk.f32.mxu1 %vm1056_vm1, %v1055_v2 }
 0x3a4   :  { %982 = vmatpush3.msra.mxu1 %v470_v48 }
 0x3a5   :  { %986 = vmatprep.subr.mxu1 %v1055_v2  ;;  %v702_v51 = vpop.permute.xlu1 %701 }
 0x3a6   :  { %v703_v53 = vmul.f32 %v1141_v14, %v702_v51 }
 0x3a9   :  { %984 = vmatmul.mubr.msk.f32.vlgmr.msra.gmra.mrb[0].mxu1 %vm42_vm2, %v919_v49  ;;  %v781_v54 = vpop.permute.xlu1 %780 }
 0x3aa   :  { %987 = vmatpush3.msra.mxu1 %v624_v50  ;;  %988 = vmatprep.mubr.msk.f32.mxu1 %vm1056_vm1, %v1055_v2  ;;  %v782_v56 = vmul.f32 %v1154_v18, %v781_v54 }
 0x3ab   :  { %991 = vmatprep.subr.mxu1 %v1055_v2 }
 0x3b1   :  { %989 = vmatmul.mubr.msk.f32.vlgmr.msra.gmra.mrb[0].mxu1 %vm42_vm2, %v923_v52 }
 0x3b2   :  { %992 = vmatpush3.msra.mxu1 %v703_v53  ;;  %993 = vmatprep.mubr.msk.f32.mxu1 %vm1056_vm1, %v1055_v2 }
 0x3b3   :  { %996 = vmatprep.subr.mxu1 %v1055_v2 }
 0x3b9   :  { %994 = vmatmul.mubr.msk.f32.vlgmr.msra.gmra.mrb[0].mxu1 %vm42_vm2, %v925_v55 }
 0x3ba   :  { %997 = vmatpush3.msra.mxu1 %v782_v56  ;;  %998 = vmatprep.mubr.msk.f32.mxu1 %vm1056_vm1, %v1055_v2  ;;  %v930_v2 = vld [vmem:[%s1239_s3 + $0x18] sm:$0xff] }
 0x3c1   :  { %999 = vmatmul.mubr.msk.f32.vlgmr.msra.gmra.mrb[0].mxu1 %vm42_vm2, %v927_v57 }
 0x494   :  { %v854_v58 = vpop.f32.mrb[0].mxu1 }
 0x495   :  { %863 = vadd.xlane.f32.xlu1 %v854_v58  ;;  %v1000_v59 = vpop.f32.mrb[1].mxu1 }
 0x522   :  { %v864_v60 = vpop.xlane.xlu1 %863 }
 0x523   :  { %v865_v61 = vmul.f32 0.03125, %v864_v60 }
 0x525   :  { %v866_v62 = vsub.f32 %v854_v58, %v865_v61 }
 0x527   :  { %v867_v63 = vmul.f32 %v1128_v11, %v866_v62 }
 0x529   :  { %v868_v1 = vmul.f32 %v867_v63, %v867_v63 }
 0x52b   :  { %869 = vadd.xlane.f32.xlu0 %v868_v1 }
 0x541   :  { %883 = vperm.xlu0 %1025, %v930_v2  }
 0x5b8   :  { %v870_v3 = vpop.xlane.xlu0 %869 }
 0x5b9   :  { %v871_v4 = vmul.f32 0.03125, %v870_v3 }
 0x5bb   :  { %v872_v5 = vadd.f32 1e-05, %v871_v4 }
 0x5bd   :  { %1029 = vrsqrt.f32 %v872_v5 }
 0x5c0   :  { %v884_v11 = vpop.permute.xlu0 %883 }
 0x5c7   :  { %v1030_v7 = vpop.eup %1029 }
 0x5c8   :  { %v874_v8 = vmul.f32 %v1030_v7, %v929_v6 }
 0x5ca   :  { %877 = vperm.xlu1 %1026, %v874_v8  }
 0x649   :  { %v878_v9 = vpop.permute.xlu1 %877 }
 0x64a   :  { %v880_v10 = vmul.f32 %v878_v9, %v866_v62 }
 0x64c   :  { %v886_v12 = vadd.f32 %v884_v11, %v880_v10 }
 0x64e   :  { %v887_v13 = vmul.f32 0.5, %v886_v12 }
 0x650   :  { %v888_v14 = vadd.f32 %v887_v13, %v1091_v0 }
 0x652   :  { %889 = vst [vmem:[#allocation2] sm:$0xff] %v888_v14 }
 0x653   :  { %1042 = shalt.err (!%p1039_p4)
}
 0x654   :  { %s1043_s7 = scalar_lea.hbm %s1240_s4, 128 }
 0x655   :  { %p1044_p5 = scmp.ne.s32.totalorder %s1240_s4, %s1043_s7  ;;  %p1047_p6 = scmp.lt.u32.totalorder %s1043_s7, %s1240_s4 }
 0x657   :  { %p1049_p7 = pnand %p1047_p6, %p1044_p5 }
 0x659   :  { %1052 = shalt.err (!%p1049_p7)
}
 0x65a   :  { %899 = dma.vmem_to_hbm [thread:$0]  %s897_s30, 128, %s1240_s4, [#allocation3]  }
 0x65b   :  { %1053 = dma.done.wait [#allocation3], 128  }
 0x65c   :  { %1054 = vsyncadd [#allocation3], 4294967168 }
 0x65d   :  { %903 = vsyncpa [#allocation3], 1 }

</bundles_post_ra>
